<compile_context>
chip_gen: v7x
topology: tpu7x:2x2x1
jax: 0.10.0
libtpu: 0.0.40
codegen_flags: <defaults>
</compile_context>

<pallas_src>
import functools

import jax
import jax.numpy as jnp
import numpy as np
from jax import lax
from jax.experimental import pallas as pl
from jax.experimental.pallas import tpu as pltpu

NEIGHBOR_K = 3


def _img2class_kernel(q_ref, s_ref, o_ref, *, neighbor_k, hw):
    # q_ref: (TB*HW, C) bf16 query local descriptors (TB whole query images)
    # s_ref: (1, C, M)  bf16 pre-normalized support descriptors of ONE class
    # o_ref: (TB, Wc)   f32 output block, resident across the class grid axis
    j = pl.program_id(1)
    rows, _ = q_ref.shape
    tb, wc = o_ref.shape

    @pl.when(j == 0)
    def _init():
        o_ref[...] = jnp.zeros_like(o_ref)

    # Row-wise L2 normalization of the query descriptors (f32 math, rsqrt->EUP).
    q = q_ref[...].astype(jnp.float32)
    sumsq = jnp.sum(q * q, axis=1, keepdims=True)                 # (rows, 1)
    qn = (q * lax.rsqrt(jnp.maximum(sumsq, 1e-24))).astype(jnp.bfloat16)

    # One (rows, C) @ (C, M) matmul on the MXU, f32 accumulation.
    sims = jnp.dot(qn, s_ref[0], preferred_element_type=jnp.float32)

    # top-k via iterative max + mask-all-equals (cheaper than argmax masking;
    # differs from torch.topk only on exact duplicate maxima).
    # TODO(synk): on v6e/v7x the compare/select chain could run in bf16 for ~2x
    # VPU throughput; kept f32 for exactness of the self-test.
    x = sims
    tot = jnp.zeros((rows, 1), jnp.float32)
    for _ in range(neighbor_k):
        cur = jnp.max(x, axis=1, keepdims=True)                   # (rows, 1)
        tot = tot + cur
        x = jnp.where(x == cur, jnp.float32(-1e30), x)

    # Sum the HW spatial rows of each query, scatter into class column j.
    per_q = jnp.sum(tot.reshape(tb, hw), axis=1, keepdims=True)   # (TB, 1)
    col = lax.broadcasted_iota(jnp.int32, (tb, wc), 1)
    o_ref[...] = o_ref[...] + jnp.where(col == j, per_q, 0.0)


def _vmem_bytes_per_step(tb, hw, c, m, wc):
    """Rough per-grid-step VMEM footprint (blocks + live intermediates)."""
    rows = tb * hw
    q_blk = 2 * rows * c * 2          # bf16 query block, double-buffered
    s_blk = 2 * c * m * 2             # bf16 per-class support block, dbl-buf
    o_blk = 2 * tb * wc * 4           # f32 output block
    live = rows * c * (4 + 2)         # q (f32) + qn (bf16)
    live += 2 * rows * m * 4          # sims + masked working copy (f32)
    live += 4 * rows * 4              # tot / cur / misc row temporaries
    return q_blk + s_blk + o_blk + live


def _vmem_budget_bytes():
    """~75% of physical VMEM (generation-aware: ~96 MiB v5e/v6e, ~48 MiB v7x)."""
    cap = 128 * 1024 * 1024
    try:
        info = pltpu.get_tpu_info()
        cap = int(getattr(info, "vmem_capacity_bytes", None) or cap)
    except Exception:
        pass
    return int(cap * 0.75)


def _pick_block_b(B, hw, c, m, wc, vmem_budget, target_rows=512):
    """Pick TB: multiple of 8 (sublane-aligned (TB, Wc) output block), big
    enough to feed the MXU (~target_rows rows/step), small enough for the VMEM
    budget, and leaving >=2 batch grid steps when B is large (2nd TC on v7x)."""
    if B <= 8:
        return B  # single block; block dims equal full dims -> layout-legal
    cdiv = lambda a, b: -(-a // b)
    tb = 8 * max(1, cdiv(target_rows, hw * 8))       # reach target MXU rows
    tb = min(tb, 8 * max(1, cdiv(B, 16)))            # keep >=2 batch steps
    while tb > 8 and _vmem_bytes_per_step(tb, hw, c, m, wc) > vmem_budget:
        tb -= 8
    return tb


def img_to_class_metric(x1, x2, neighbor_k=NEIGHBOR_K, block_b=None):
    """x1: (B, C, H, W) queries.
    x2: (W_cls, C, M) stacked support descriptors, or a list of (C, M) arrays
        (one per class, as in the PyTorch module)."""
    if isinstance(x2, (list, tuple)):
        x2 = jnp.stack([jnp.asarray(t) for t in x2], axis=0)
    B, C, H, W = x1.shape
    HW = H * W
    Wc, C2, M = x2.shape
    assert C2 == C and M >= neighbor_k

    # Support preprocessing (once): L2-normalize over C, cast to bf16.
    s = x2.astype(jnp.float32)
    s_norm = jnp.sqrt(jnp.sum(s * s, axis=1, keepdims=True))       # (Wc,1,M)
    sn = (s / jnp.maximum(s_norm, 1e-12)).astype(jnp.bfloat16)     # (Wc,C,M)

    # Query glue: NCHW -> flat (B*HW, C) local-descriptor slab (bf16 DMA).
    q = jnp.transpose(x1.reshape(B, C, HW), (0, 2, 1))             # (B,HW,C)
    q2d = q.reshape(B * HW, C).astype(jnp.bfloat16)

    # Tiling: VMEM-aware TB, pad B to a multiple of TB (padded rows are all
    # zero -> normalized to zero -> contribute 0 and are sliced off below).
    budget = _vmem_budget_bytes()
    tb = _pick_block_b(B, HW, C, M, Wc, budget) if block_b is None else block_b
    b_pad = -(-B // tb) * tb
    if b_pad != B:
        q2d = jnp.concatenate(
            [q2d, jnp.zeros(((b_pad - B) * HW, C), q2d.dtype)], axis=0)
    rows_blk = tb * HW

    need = _vmem_bytes_per_step(tb, HW, C, M, Wc)
    vmem_limit = int(min(budget, max(32 * 1024 * 1024, 2 * need)))

    kernel = functools.partial(_img2class_kernel, neighbor_k=neighbor_k, hw=HW)

    out = pl.pallas_call(
        kernel,
        out_shape=jax.ShapeDtypeStruct((b_pad, Wc), jnp.float32),
        grid_spec=pltpu.PrefetchScalarGridSpec(
            num_scalar_prefetch=0,
            grid=(b_pad // tb, Wc),
            in_specs=[
                pl.BlockSpec((rows_blk, C), lambda i, j: (i, 0)),   # TB queries
                pl.BlockSpec((1, C, M), lambda i, j: (j, 0, 0)),    # class j
            ],
            out_specs=pl.BlockSpec((tb, Wc), lambda i, j: (i, 0)),  # resident
        ),
        compiler_params=pltpu.CompilerParams(
            dimension_semantics=("parallel", "arbitrary"),
            vmem_limit_bytes=vmem_limit),
    )(q2d, sn)
    return out[:B]


def _reference(x1, x2_stacked, neighbor_k=NEIGHBOR_K):
    B, C, H, W = x1.shape
    q = jnp.transpose(x1.reshape(B, C, H * W), (0, 2, 1))
    qn = q / jnp.linalg.norm(q, axis=-1, keepdims=True)
    sn = x2_stacked / jnp.linalg.norm(x2_stacked, axis=1, keepdims=True)
    inner = jnp.einsum('bpc,wcm->bwpm', qn, sn)
    topv = lax.top_k(inner, neighbor_k)[0]
    return jnp.sum(topv, axis=(2, 3))


if __name__ == "__main__":
    key = jax.random.PRNGKey(0)
    B, C, H, W = 10, 32, 4, 4        # 10 query images, 32 channels, 4x4 maps
    num_classes, shots = 5, 1        # 5-way; M = shots*H*W descriptors/class
    M = shots * H * W

    k1, k2 = jax.random.split(key)
    x1 = jax.random.normal(k1, (B, C, H, W), jnp.float32)
    x2 = jax.random.normal(k2, (num_classes, C, M), jnp.float32)

    out = jax.block_until_ready(img_to_class_metric(x1, x2, NEIGHBOR_K))
    ref = jax.block_until_ready(_reference(x1, x2, NEIGHBOR_K))
    # bf16 matmul inputs perturb sims at ~1e-3; tolerance loosened accordingly.
    np.testing.assert_allclose(np.asarray(out), np.asarray(ref),
                               rtol=2e-2, atol=2e-2)
    print("KERNEL_OK")
</pallas_src>

<mosaic_0001>
module attributes {stable_mosaic.version = 11 : i64} {
  func.func @_img2class_kernel(%arg0: i32, %arg1: i32, %arg2: memref<128x32xbf16, #tpu.memory_space<vmem>>, %arg3: memref<1x32x16xbf16, #tpu.memory_space<vmem>>, %arg4: memref<8x5xf32, #tpu.memory_space<vmem>>) attributes {dimension_semantics = [#tpu.dimension_semantics<parallel>, #tpu.dimension_semantics<arbitrary>], iteration_bounds = array<i64: 2, 5>, scalar_prefetch = 0 : i64, scratch_operands = 0 : i64, tpu.core_type = #tpu.core_type<tc>, window_params = [{transform_indices = @transform_0, window_bounds = array<i64: 128, 32>}, {transform_indices = @transform_1, window_bounds = array<i64: 1, 32, 16>}, {transform_indices = @transform_2, window_bounds = array<i64: 8, 5>}]} {
    %c0_i32 = arith.constant 0 : i32
    %0 = arith.cmpi eq, %arg1, %c0_i32 : i32
    %1 = arith.extui %0 : i1 to i32
    %c0_i32_0 = arith.constant 0 : i32
    %2 = arith.cmpi ne, %1, %c0_i32_0 : i32
    scf.if %2 {
      %cst_19 = arith.constant 0.000000e+00 : f32
      %48 = vector.broadcast %cst_19 : f32 to vector<8x5xf32>
      %c0_20 = arith.constant 0 : index
      %c0_21 = arith.constant 0 : index
      %49 = vector.load %arg4[%c0_20, %c0_21] : memref<8x5xf32, #tpu.memory_space<vmem>>, vector<8x5xf32>
      tpu.vector_store %arg4[%c0_20, %c0_21], %48 {strides = array<i32>} : memref<8x5xf32, #tpu.memory_space<vmem>>, vector<8x5xf32>,
    } else {
    }
    %c0 = arith.constant 0 : index
    %c0_1 = arith.constant 0 : index
    %3 = vector.load %arg2[%c0, %c0_1] : memref<128x32xbf16, #tpu.memory_space<vmem>>, vector<128x32xbf16>
    %4 = arith.extf %3 : vector<128x32xbf16> to vector<128x32xf32>
    %5 = arith.mulf %4, %4 : vector<128x32xf32>
    %cst = arith.constant dense<0.000000e+00> : vector<128xf32>
    %6 = vector.multi_reduction <add>, %5, %cst [1] : vector<128x32xf32> to vector<128xf32>
    %7 = vector.shape_cast %6 : vector<128xf32> to vector<128x1xf32>
    %cst_2 = arith.constant 1.000000e-24 : f32
    %8 = vector.broadcast %cst_2 : f32 to vector<128x1xf32>
    %9 = arith.maximumf %7, %8 : vector<128x1xf32>
    %10 = math.rsqrt %9 : vector<128x1xf32>
    %11 = vector.broadcast %10 : vector<128x1xf32> to vector<128x32xf32>
    %12 = arith.mulf %4, %11 : vector<128x32xf32>
    %13 = arith.truncf %12 : vector<128x32xf32> to vector<128x32xbf16>
    %c0_3 = arith.constant 0 : index
    %c0_4 = arith.constant 0 : index
    %c0_5 = arith.constant 0 : index
    %14 = vector.load %arg3[%c0_3, %c0_4, %c0_5] : memref<1x32x16xbf16, #tpu.memory_space<vmem>>, vector<1x32x16xbf16>
    %15 = vector.shape_cast %14 : vector<1x32x16xbf16> to vector<32x16xbf16>
    %cst_6 = arith.constant dense<0.000000e+00> : vector<128x16xf32>
    %16 = tpu.matmul %13, %15, %cst_6 {dimension_numbers = #tpu.dot_dimension_numbers<[1], [0], [0], [1], [0, 0, 1, 1], [], []>} : vector<128x32xbf16>, vector<32x16xbf16>, vector<128x16xf32> -> vector<128x16xf32>
    %cst_7 = arith.constant 0.000000e+00 : f32
    %17 = vector.broadcast %cst_7 : f32 to vector<128x1xf32>
    %cst_8 = arith.constant dense<0xFF800000> : vector<128xf32>
    %18 = vector.multi_reduction <maximumf>, %16, %cst_8 [1] : vector<128x16xf32> to vector<128xf32>
    %19 = vector.shape_cast %18 : vector<128xf32> to vector<128x1xf32>
    %20 = arith.addf %17, %19 : vector<128x1xf32>
    %21 = vector.broadcast %19 : vector<128x1xf32> to vector<128x16xf32>
    %22 = arith.cmpf oeq, %16, %21 : vector<128x16xf32>
    %cst_9 = arith.constant -1.000000e+30 : f32
    %23 = vector.broadcast %cst_9 : f32 to vector<128x16xf32>
    %24 = arith.select %22, %23, %16 : vector<128x16xi1>, vector<128x16xf32>
    %cst_10 = arith.constant dense<0xFF800000> : vector<128xf32>
    %25 = vector.multi_reduction <maximumf>, %24, %cst_10 [1] : vector<128x16xf32> to vector<128xf32>
    %26 = vector.shape_cast %25 : vector<128xf32> to vector<128x1xf32>
    %27 = arith.addf %20, %26 : vector<128x1xf32>
    %28 = vector.broadcast %26 : vector<128x1xf32> to vector<128x16xf32>
    %29 = arith.cmpf oeq, %24, %28 : vector<128x16xf32>
    %cst_11 = arith.constant -1.000000e+30 : f32
    %30 = vector.broadcast %cst_11 : f32 to vector<128x16xf32>
    %31 = arith.select %29, %30, %24 : vector<128x16xi1>, vector<128x16xf32>
    %cst_12 = arith.constant dense<0xFF800000> : vector<128xf32>
    %32 = vector.multi_reduction <maximumf>, %31, %cst_12 [1] : vector<128x16xf32> to vector<128xf32>
    %33 = vector.shape_cast %32 : vector<128xf32> to vector<128x1xf32>
    %34 = arith.addf %27, %33 : vector<128x1xf32>
    %35 = vector.shape_cast %34 : vector<128x1xf32> to vector<8x16xf32>
    %cst_13 = arith.constant dense<0.000000e+00> : vector<8xf32>
    %36 = vector.multi_reduction <add>, %35, %cst_13 [1] : vector<8x16xf32> to vector<8xf32>
    %37 = vector.shape_cast %36 : vector<8xf32> to vector<8x1xf32>
    %38 = tpu.iota {dimensions = array<i32: 1>} : vector<8x5xi32>
    %c0_14 = arith.constant 0 : index
    %c0_15 = arith.constant 0 : index
    %39 = vector.load %arg4[%c0_14, %c0_15] : memref<8x5xf32, #tpu.memory_space<vmem>>, vector<8x5xf32>
    %40 = vector.broadcast %arg1 : i32 to vector<8x5xi32>
    %41 = arith.cmpi eq, %38, %40 : vector<8x5xi32>
    %cst_16 = arith.constant 0.000000e+00 : f32
    %42 = vector.shape_cast %37 : vector<8x1xf32> to vector<8x1xf32>
    %43 = vector.broadcast %42 : vector<8x1xf32> to vector<8x5xf32>
    %44 = vector.broadcast %cst_16 : f32 to vector<8x5xf32>
    %45 = arith.select %41, %43, %44 : vector<8x5xi1>, vector<8x5xf32>
    %46 = arith.addf %39, %45 : vector<8x5xf32>
    %c0_17 = arith.constant 0 : index
    %c0_18 = arith.constant 0 : index
    %47 = vector.load %arg4[%c0_17, %c0_18] : memref<8x5xf32, #tpu.memory_space<vmem>>, vector<8x5xf32>
    tpu.vector_store %arg4[%c0_17, %c0_18], %46 {strides = array<i32>} : memref<8x5xf32, #tpu.memory_space<vmem>>, vector<8x5xf32>,
    return
  }
  func.func @transform_0(%arg0: i32, %arg1: i32) -> (i32, i32) {
    %c0_i32 = arith.constant 0 : i32
    %c0_i32_0 = arith.constant 0 : i32
    return %arg0, %c0_i32 : i32, i32
  }
  func.func @transform_1(%arg0: i32, %arg1: i32) -> (i32, i32, i32) {
    %c0_i32 = arith.constant 0 : i32
    %c0_i32_0 = arith.constant 0 : i32
    %c0_i32_1 = arith.constant 0 : i32
    return %arg1, %c0_i32, %c0_i32_0 : i32, i32, i32
  }
  func.func @transform_2(%arg0: i32, %arg1: i32) -> (i32, i32) {
    %c0_i32 = arith.constant 0 : i32
    %c0_i32_0 = arith.constant 0 : i32
    return %arg0, %c0_i32 : i32, i32
  }
}

</mosaic_0001>

<bundles_post_ra>
// kernel: tpu_custom_call.1
= control target key start
LH: loop header
LB: loop body
LE: loop exit
PB: predicated region body
PF: predicated region fallthrough
CT: control target
= control target key end

     0   :  { %s1151_s9 = smov 0   ;;  %s1153_s10 = smov 0   ;;  %s1684_s0 = inlined_call_operand.vmem [shape: bf16[256,32], index: 0, kind: input, shape index: {}]   ;;  %s1685_s1 = inlined_call_operand.vmem [shape: bf16[5,32,16], index: 1, kind: input, shape index: {}]   ;;  %s1686_s2 = inlined_call_operand.vmem [shape: f32[16,5], index: 2, kind: output, shape index: {}]  }
   0x1   :  { %s1155_s11 = smov 0   ;;  %s1157_s12 = smov 0  }
   0x2   :  { %s1159_s13 = smov 0  }
   0x3 LB: > { %s21_s14 = sadd.s32 1, %s1125_s11  ;;  %s24_s15 = sadd.s32 1, %s1129_s12  ;;  %s1133_s13 = sphi %s1159_s13, %s12_s13   ;;  %s1129_s12 = sphi %s1157_s12, %s1690_s12   ;;  %s1125_s11 = sphi %s1155_s11, %s1689_s11   ;;  %s1121_s10 = sphi %s1153_s10, %s1688_s10   ;;  %s1117_s9 = sphi %s1151_s9, %s1687_s9  }
   0x4   : > { %p22_p0 = scmp.ge.s32.totalorder %s21_s14, 5  ;;  %p927_p1 = scmp.ge.s32.totalorder %s1133_s13, 1 }
   0x5   : > { %p135_p2 = scmp.lt.s32.totalorder %s1133_s13, 11 }
   0x6   : > { %s1692_s14 = smov (%p22_p0, %s21_s14), 0  ;;  %s1694_s15 = smov (!%p22_p0, %s24_s15), %s1129_s12 }
   0x7   : > { %p136_p3 = pnand %p927_p1, %p135_p2  ;;  %p26_p4 = scmp.ge.s32.totalorder %s1694_s15, 2 }
   0x8   : > { %s928_s16 = sshll.u32 (!%p136_p3), %s1121_s10, 4  ;;  %p167_p5 = scmp.lt.s32.totalorder (!%p136_p3), %s1117_s9, 4 }
   0x9   : > { %s1696_s15 = smov (%p26_p4, %s1694_s15), 0  ;;  %139 = sbr.rel (%p136_p3) target bundleno = 1029 (0x405), region = 28 }
   0xa   : > { %p162_p6 = scmp.lt.s32.totalorder (!%p136_p3), %s928_s16, 31  ;;  %p172_p7 = scmp.lt.s32.totalorder (!%p136_p3), %s1121_s10, 1 }
   0xb   : > { %p933_p8 = scmp.ne.s32.totalorder (!%p136_p3), %s1117_s9, 0 }
  0x10   : > { %s168_s17 = scalar_select %p167_p5, %s1117_s9, 4 }
  0x11   : > { %s1698_s16 = smov (!%p162_p6, %s928_s16), 31  ;;  %s1700_s10 = smov (!%p172_p7, %s1121_s10), 1 }
  0x12   : > { %s946_s18 = sshll.u32 %s168_s17, 4  ;;  %s929_s19 = sshll.u32 %s1698_s16, 2  ;;  %vm181_vm0 = vcmask (!%p933_p8), 39936   ;;  %v1135_v0 = vmov (!%p933_p8), 0.0  }
  0x13   : > { %s1188_s22 = scalar_lea.vmem %s1685_s1, %s946_s18  ;;  %s1193_s25 = scalar_lea.vmem %s1684_s0, %s929_s19 }
  0x14   : > { %s932_s26 = sshll.u32 %s1700_s10, 3  ;;  %180 = sbr.rel (%p933_p8) target bundleno = 27 (0x1b), region = 32 }
  0x15   : > { %s1198_s29 = scalar_lea.vmem %s1686_s2, %s932_s26 }
  0x16   : > { %182 = vst.msk [vmem:[%s1198_s29] sm:$0xff] (!%p933_p8), %vm181_vm0, %v1135_v0 }
  0x1b PF: > { %v979_v1 = vld [vmem:[%s1193_s25 + $0x8] sm:$0xff]   ;;  %v948_v2 = vld [vmem:[%s1193_s25] sm:$0xff]   ;;  %vm231_vm1 = vcmask 261120   ;;  %v980_v23 = vld [vmem:[%s1193_s25 + $0x10] sm:$0xff]   ;;  %vm473_vm2 = vcmask 130048  }
  0x1c   : > { %v982_v3 = vld [vmem:[%s1193_s25 + $0x20] sm:$0xff]   ;;  %v1205_v4 = vunpack.c.l.bf16 %v979_v1  ;;  %v1207_v5 = vunpack.c.l.bf16 %v948_v2  ;;  %v1209_v6 = vunpack.c.h.bf16 %v979_v1  ;;  %v1211_v7 = vunpack.c.h.bf16 %v948_v2  ;;  %v983_v10 = vld [vmem:[%s1193_s25 + $0x28] sm:$0xff]   ;;  %v981_v30 = vld [vmem:[%s1193_s25 + $0x18] sm:$0xff]  }
  0x1d   : > { %v1213_v8 = vunpack.c.h.bf16 %v982_v3  ;;  %v1215_v9 = vunpack.c.l.bf16 %v982_v3  ;;  %v1228_v17 = vunpack.c.h.bf16 %v983_v10  ;;  %v1230_v18 = vunpack.c.l.bf16 %v983_v10  ;;  %v984_v37 = vld [vmem:[%s1193_s25 + $0x30] sm:$0xff]   ;;  %v985_v44 = vld [vmem:[%s1193_s25 + $0x38] sm:$0xff]   ;;  %v1061_v57 = vld [vmem:[%s1188_s22] sm:$0xff]  }
  0x1e   : > { %v217_v11 = vmul.f32 %v1205_v4, %v1205_v4  ;;  %v215_v12 = vmul.f32 %v1207_v5, %v1207_v5  ;;  %v218_v13 = vmul.f32 %v1209_v6, %v1209_v6  ;;  %v216_v14 = vmul.f32 %v1211_v7, %v1211_v7  ;;  %996 = vmatprep.subr.bf16.mxu0 %v1061_v57  ;;  %v1062_v58 = vld [vmem:[%s1188_s22 + $0x8] sm:$0xff]  }
  0x1f   : > { %v224_v21 = vmul.f32 %v1213_v8, %v1213_v8  ;;  %v223_v22 = vmul.f32 %v1215_v9, %v1215_v9  ;;  %v226_v24 = vmul.f32 %v1228_v17, %v1228_v17  ;;  %v225_v25 = vmul.f32 %v1230_v18, %v1230_v18  ;;  %1016 = vmatprep.subr.bf16.mxu1 %v1061_v57 }
  0x20   : > { %v238_v15 = vsel %vm231_vm1, %v217_v11, 0.0  ;;  %v232_v16 = vsel %vm231_vm1, %v215_v12, 0.0  ;;  %v241_v19 = vsel %vm231_vm1, %v218_v13, 0.0  ;;  %v235_v20 = vsel %vm231_vm1, %v216_v14, 0.0  ;;  %997 = vmatpush3.bf16.msra.mxu0 %v1061_v57  ;;  %1018 = vmatpush3.bf16.msra.mxu1 %v1061_v57 }
  0x21   : > { %239 = vadd.xlane.f32.xlu1 %v238_v15  ;;  %233 = vadd.xlane.f32.xlu0 %v232_v16  ;;  %v259_v26 = vsel %vm231_vm1, %v224_v21, 0.0  ;;  %v256_v27 = vsel %vm231_vm1, %v223_v22, 0.0  ;;  %v1245_v28 = vunpack.c.h.bf16 %v980_v23  ;;  %v1247_v29 = vunpack.c.l.bf16 %v980_v23 }
  0x22   : > { %v265_v31 = vsel %vm231_vm1, %v226_v24, 0.0  ;;  %v262_v32 = vsel %vm231_vm1, %v225_v25, 0.0  ;;  %v1256_v35 = vunpack.c.h.bf16 %v981_v30  ;;  %v1258_v36 = vunpack.c.l.bf16 %v981_v30  ;;  %998 = vmatprep.subr.bf16.mxu0 %v1062_v58  ;;  %1017 = vmatprep.subr.bf16.mxu1 %v1062_v58 }
  0x23   : > { %v220_v33 = vmul.f32 %v1245_v28, %v1245_v28  ;;  %v219_v34 = vmul.f32 %v1247_v29, %v1247_v29  ;;  %v1261_v38 = vunpack.c.h.bf16 %v984_v37  ;;  %v1263_v39 = vunpack.c.l.bf16 %v984_v37 }
  0x24   : > { %v222_v42 = vmul.f32 %v1256_v35, %v1256_v35  ;;  %v221_v43 = vmul.f32 %v1258_v36, %v1258_v36  ;;  %v1272_v45 = vunpack.c.h.bf16 %v985_v44  ;;  %v1274_v46 = vunpack.c.l.bf16 %v985_v44  ;;  %999 = vmatpush3.bf16.msra.mxu0 %v1062_v58  ;;  %1019 = vmatpush3.bf16.msra.mxu1 %v1062_v58 }
  0x25   : > { %242 = vadd.xlane.f32.xlu1 %v241_v19  ;;  %236 = vadd.xlane.f32.xlu0 %v235_v20  ;;  %v247_v40 = vsel %vm231_vm1, %v220_v33, 0.0  ;;  %v244_v41 = vsel %vm231_vm1, %v219_v34, 0.0  ;;  %v228_v49 = vmul.f32 %v1261_v38, %v1261_v38  ;;  %v227_v50 = vmul.f32 %v1263_v39, %v1263_v39 }
  0x26   : > { %v253_v47 = vsel %vm231_vm1, %v222_v42, 0.0  ;;  %v250_v48 = vsel %vm231_vm1, %v221_v43, 0.0  ;;  %v230_v53 = vmul.f32 %v1272_v45, %v1272_v45  ;;  %v229_v54 = vmul.f32 %v1274_v46, %v1274_v46 }
  0x27   : > { %v271_v51 = vsel %vm231_vm1, %v228_v49, 0.0  ;;  %v268_v52 = vsel %vm231_vm1, %v227_v50, 0.0 }
  0x28   : > { %v277_v55 = vsel %vm231_vm1, %v230_v53, 0.0  ;;  %v274_v56 = vsel %vm231_vm1, %v229_v54, 0.0 }
  0x29   : > { %260 = vadd.xlane.f32.xlu1 %v259_v26  ;;  %257 = vadd.xlane.f32.xlu0 %v256_v27 }
  0x2d   : > { %266 = vadd.xlane.f32.xlu1 %v265_v31  ;;  %263 = vadd.xlane.f32.xlu0 %v262_v32 }
  0x31   : > { %248 = vadd.xlane.f32.xlu1 %v247_v40  ;;  %245 = vadd.xlane.f32.xlu0 %v244_v41 }
  0x35   : > { %254 = vadd.xlane.f32.xlu1 %v253_v47  ;;  %251 = vadd.xlane.f32.xlu0 %v250_v48 }
  0x39   : > { %272 = vadd.xlane.f32.xlu1 %v271_v51  ;;  %269 = vadd.xlane.f32.xlu0 %v268_v52 }
  0x3d   : > { %278 = vadd.xlane.f32.xlu1 %v277_v55  ;;  %275 = vadd.xlane.f32.xlu0 %v274_v56 }
  0xae   : > { %v240_v59 = vpop.xlane.xlu1 %239  ;;  %v234_v60 = vpop.xlane.xlu0 %233 }
  0xaf   : > { %v282_v61 = vmax.f32 %v240_v59, 1e-24  ;;  %v280_v62 = vmax.f32 %v234_v60, 1e-24 }
  0xb1   : > { %1063 = vrsqrt.f32 %v282_v61 }
  0xb2   : > { %v243_v63 = vpop.xlane.xlu1 %242  ;;  %v237_v0 = vpop.xlane.xlu0 %236  ;;  %1065 = vrsqrt.f32 %v280_v62 }
  0xb3   : > { %v283_v1 = vmax.f32 %v243_v63, 1e-24  ;;  %v281_v2 = vmax.f32 %v237_v0, 1e-24 }
  0xb5   : > { %1067 = vrsqrt.f32 %v283_v1 }
  0xb6   : > { %1069 = vrsqrt.f32 %v281_v2  ;;  %v261_v3 = vpop.xlane.xlu1 %260  ;;  %v258_v10 = vpop.xlane.xlu0 %257 }
  0xb7   : > { %v289_v11 = vmax.f32 %v261_v3, 1e-24  ;;  %v288_v12 = vmax.f32 %v258_v10, 1e-24 }
  0xb9   : > { %1071 = vrsqrt.f32 %v289_v11 }
  0xba   : > { %1073 = vrsqrt.f32 %v288_v12  ;;  %v267_v13 = vpop.xlane.xlu1 %266  ;;  %v264_v14 = vpop.xlane.xlu0 %263 }
  0xbb   : > { %v291_v15 = vmax.f32 %v267_v13, 1e-24  ;;  %v290_v16 = vmax.f32 %v264_v14, 1e-24  ;;  %v1064_v19 = vpop.eup %1063 }
  0xbc   : > { %v1066_v20 = vpop.eup %1065  ;;  %v314_v27 = vmul.f32 %v1064_v19, %v1205_v4 }
  0xbd   : > { %1075 = vrsqrt.f32 %v291_v15  ;;  %v312_v31 = vmul.f32 %v1066_v20, %v1207_v5 }
  0xbe   : > { %1077 = vrsqrt.f32 %v290_v16  ;;  %v249_v21 = vpop.xlane.xlu1 %248  ;;  %v246_v22 = vpop.xlane.xlu0 %245 }
  0xbf   : > { %v1068_v23 = vpop.eup %1067  ;;  %v285_v24 = vmax.f32 %v249_v21, 1e-24  ;;  %v284_v25 = vmax.f32 %v246_v22, 1e-24 }
  0xc0   : > { %v1070_v26 = vpop.eup %1069  ;;  %v315_v30 = vmul.f32 %v1068_v23, %v1209_v6 }
  0xc1   : > { %1079 = vrsqrt.f32 %v285_v24  ;;  %v313_v32 = vmul.f32 %v1070_v26, %v1211_v7 }
  0xc2   : > { %1081 = vrsqrt.f32 %v284_v25  ;;  %v255_v33 = vpop.xlane.xlu1 %254  ;;  %v252_v34 = vpop.xlane.xlu0 %251  ;;  %v329_v37 = vpack.c.bf16 %v315_v30, %v314_v27 }
  0xc3   : > { %v1072_v40 = vpop.eup %1071  ;;  %v287_v41 = vmax.f32 %v255_v33, 1e-24  ;;  %v286_v42 = vmax.f32 %v252_v34, 1e-24  ;;  %v328_v43 = vpack.c.bf16 %v313_v32, %v312_v31 }
  0xc4   : > { %v1074_v44 = vpop.eup %1073  ;;  %v321_v47 = vmul.f32 %v1072_v40, %v1213_v8 }
  0xc5   : > { %1083 = vrsqrt.f32 %v287_v41  ;;  %1000 = vmatprep.mubr.msk.bf16.mxu0 %vm231_vm1, %v328_v43  ;;  %v320_v4 = vmul.f32 %v1074_v44, %v1215_v9 }
  0xc6   : > { %1085 = vrsqrt.f32 %v286_v42  ;;  %1001 = vmatmul.mubr.msk.bf16.vlgmr.msra.gmra.mrb[0].mxu0 %vm231_vm1, %v329_v37  ;;  %v273_v5 = vpop.xlane.xlu1 %272  ;;  %v270_v6 = vpop.xlane.xlu0 %269 }
  0xc7   : > { %v1076_v7 = vpop.eup %1075  ;;  %v293_v48 = vmax.f32 %v273_v5, 1e-24  ;;  %v292_v49 = vmax.f32 %v270_v6, 1e-24  ;;  %v332_v50 = vpack.c.bf16 %v321_v47, %v320_v4 }
  0xc8   : > { %v1078_v51 = vpop.eup %1077  ;;  %v323_v52 = vmul.f32 %v1076_v7, %v1228_v17 }
  0xc9   : > { %1087 = vrsqrt.f32 %v293_v48  ;;  %1008 = vmatprep.mubr.msk.bf16.mxu1 %vm231_vm1, %v332_v50  ;;  %v322_v8 = vmul.f32 %v1078_v51, %v1230_v18 }
  0xca   : > { %1089 = vrsqrt.f32 %v292_v49  ;;  %v279_v53 = vpop.xlane.xlu1 %278  ;;  %v276_v9 = vpop.xlane.xlu0 %275 }
  0xcb   : > { %v1080_v54 = vpop.eup %1079  ;;  %v295_v55 = vmax.f32 %v279_v53, 1e-24  ;;  %v294_v56 = vmax.f32 %v276_v9, 1e-24  ;;  %v333_v57 = vpack.c.bf16 %v323_v52, %v322_v8 }
  0xcc   : > { %v1082_v58 = vpop.eup %1081  ;;  %v317_v59 = vmul.f32 %v1080_v54, %v1245_v28 }
  0xcd   : > { %1091 = vrsqrt.f32 %v295_v55  ;;  %1009 = vmatmul.mubr.msk.bf16.vlgmr.msra.gmra.mrb[0].mxu1 %vm231_vm1, %v333_v57  ;;  %v316_v17 = vmul.f32 %v1082_v58, %v1247_v29 }
  0xce   : > { %1093 = vrsqrt.f32 %v294_v56 }
  0xcf   : > { %v1084_v60 = vpop.eup %1083  ;;  %v330_v61 = vpack.c.bf16 %v317_v59, %v316_v17 }
  0xd0   : > { %v1086_v62 = vpop.eup %1085  ;;  %v319_v18 = vmul.f32 %v1084_v60, %v1256_v35 }
  0xd1   : > { %1004 = vmatprep.mubr.msk.bf16.mxu0 %vm231_vm1, %v330_v61  ;;  %v318_v63 = vmul.f32 %v1086_v62, %v1258_v36 }
  0xd3   : > { %v1088_v0 = vpop.eup %1087  ;;  %v331_v1 = vpack.c.bf16 %v319_v18, %v318_v63 }
  0xd4   : > { %v1090_v2 = vpop.eup %1089  ;;  %v325_v28 = vmul.f32 %v1088_v0, %v1261_v38 }
  0xd5   : > { %1005 = vmatmul.mubr.msk.bf16.gmra.mrb[4].mxu0 %vm231_vm1, %v331_v1  ;;  %v324_v3 = vmul.f32 %v1090_v2, %v1263_v39 }
  0xd7   : > { %v1092_v29 = vpop.eup %1091  ;;  %v334_v10 = vpack.c.bf16 %v325_v28, %v324_v3 }
  0xd8   : > { %v1094_v11 = vpop.eup %1093  ;;  %v327_v12 = vmul.f32 %v1092_v29, %v1272_v45 }
  0xd9   : > { %1012 = vmatprep.mubr.msk.bf16.mxu1 %vm231_vm1, %v334_v10  ;;  %v326_v35 = vmul.f32 %v1094_v11, %v1274_v46 }
  0xdb   : > { %v335_v13 = vpack.c.bf16 %v327_v12, %v326_v35 }
  0xdd   : > { %1013 = vmatmul.mubr.msk.bf16.gmra.mrb[4].mxu1 %vm231_vm1, %v335_v13 }
 0x199   : > { %v1002_v36 = vpop.f32.mrb[0].mxu0 }
 0x19a   : > { %v1316_v14 = vpop.f32.mrb[1].mxu0  ;;  %v480_v38 = vsel %vm473_vm2, %v1002_v36, -inf }
 0x19b   : > { %481 = vmax.xlane.f32.xlu0 %v480_v38  ;;  %v1003_v39 = vpop.f32.mrb[2].mxu0  ;;  %v474_v23 = vsel %vm473_vm2, %v1316_v14, -inf }
 0x19c   : > { %v1319_v15 = vpop.f32.mrb[3].mxu0  ;;  %v483_v16 = vsel %vm473_vm2, %v1003_v39, -inf }
 0x19d   : > { %484 = vmax.xlane.f32.xlu1 %v483_v16  ;;  %v477_v24 = vsel %vm473_vm2, %v1319_v15, -inf }
 0x1a0   : > { %v1010_v45 = vpop.f32.mrb[0].mxu1 }
 0x1a1   : > { %v1322_v19 = vpop.f32.mrb[1].mxu1  ;;  %v504_v46 = vsel %vm473_vm2, %v1010_v45, -inf }
 0x1a2   : > { %505 = vmax.xlane.f32.xlu0 %v504_v46  ;;  %v1011_v20 = vpop.f32.mrb[2].mxu1  ;;  %v498_v27 = vsel %vm473_vm2, %v1322_v19, -inf }
 0x1a3   : > { %v1325_v21 = vpop.f32.mrb[3].mxu1  ;;  %v507_v22 = vsel %vm473_vm2, %v1011_v20, -inf }
 0x1a4   : > { %508 = vmax.xlane.f32.xlu1 %v507_v22  ;;  %v501_v32 = vsel %vm473_vm2, %v1325_v21, -inf }
 0x1a6   : > { %475 = vmax.xlane.f32.xlu0 %v474_v23 }
 0x1a8   : > { %478 = vmax.xlane.f32.xlu1 %v477_v24  ;;  %v1332_v25 = vpop.f32.mrb[4].mxu0 }
 0x1a9   : > { %v1334_v26 = vpop.f32.mrb[5].mxu0  ;;  %v492_v33 = vsel %vm473_vm2, %v1332_v25, -inf }
 0x1aa   : > { %499 = vmax.xlane.f32.xlu0 %v498_v27  ;;  %v1338_v30 = vpop.f32.mrb[6].mxu0  ;;  %v486_v41 = vsel %vm473_vm2, %v1334_v26, -inf }
 0x1ab   : > { %v1340_v31 = vpop.f32.mrb[7].mxu0  ;;  %v495_v34 = vsel %vm473_vm2, %v1338_v30, -inf }
 0x1ac   : > { %502 = vmax.xlane.f32.xlu1 %v501_v32  ;;  %v489_v44 = vsel %vm473_vm2, %v1340_v31, -inf }
 0x1ae   : > { %493 = vmax.xlane.f32.xlu0 %v492_v33 }
 0x1b0   : > { %496 = vmax.xlane.f32.xlu1 %v495_v34  ;;  %v1348_v37 = vpop.f32.mrb[4].mxu1 }
 0x1b1   : > { %v1350_v40 = vpop.f32.mrb[5].mxu1  ;;  %v516_v5 = vsel %vm473_vm2, %v1348_v37, -inf }
 0x1b2   : > { %487 = vmax.xlane.f32.xlu0 %v486_v41  ;;  %v1354_v42 = vpop.f32.mrb[6].mxu1  ;;  %v510_v47 = vsel %vm473_vm2, %v1350_v40, -inf }
 0x1b3   : > { %v1356_v43 = vpop.f32.mrb[7].mxu1  ;;  %v519_v6 = vsel %vm473_vm2, %v1354_v42, -inf }
 0x1b4   : > { %490 = vmax.xlane.f32.xlu1 %v489_v44  ;;  %v513_v4 = vsel %vm473_vm2, %v1356_v43, -inf }
 0x1b6   : > { %511 = vmax.xlane.f32.xlu0 %v510_v47 }
 0x1b8   : > { %514 = vmax.xlane.f32.xlu1 %v513_v4 }
 0x1ba   : > { %517 = vmax.xlane.f32.xlu0 %v516_v5 }
 0x1bc   : > { %520 = vmax.xlane.f32.xlu1 %v519_v6 }
 0x228   : > { %v1368_v7 = vpop.xlane.xlu0 %481 }
 0x229   : > { %vm540_vm3 = vcmp.eq.f32.partialorder %v1002_v36, %v1368_v7 }
 0x22a   : > { %v1371_v48 = vpop.xlane.xlu1 %484  ;;  %v1373_v49 = vsel %vm540_vm3, -1e+30, %v1002_v36 }
 0x22b   : > { %vm541_vm4 = vcmp.eq.f32.partialorder %v1003_v39, %v1371_v48  ;;  %v576_v50 = vsel %vm473_vm2, %v1373_v49, -inf }
 0x22c   : > { %577 = vmax.xlane.f32.xlu0 %v576_v50  ;;  %v1378_v51 = vsel %vm541_vm4, -1e+30, %v1003_v39 }
 0x22d   : > { %v579_v52 = vsel %vm473_vm2, %v1378_v51, -inf }
 0x22e   : > { %580 = vmax.xlane.f32.xlu1 %v579_v52 }
 0x22f   : > { %v1382_v8 = vpop.xlane.xlu0 %505 }
 0x230   : > { %vm548_vm5 = vcmp.eq.f32.partialorder %v1010_v45, %v1382_v8 }
 0x231   : > { %v1385_v53 = vpop.xlane.xlu1 %508  ;;  %v1387_v9 = vsel %vm548_vm5, -1e+30, %v1010_v45 }
 0x232   : > { %vm549_vm6 = vcmp.eq.f32.partialorder %v1011_v20, %v1385_v53  ;;  %v600_v54 = vsel %vm473_vm2, %v1387_v9, -inf }
 0x233   : > { %601 = vmax.xlane.f32.xlu0 %v600_v54  ;;  %v1392_v55 = vpop.xlane.xlu0 %475  ;;  %v1394_v56 = vsel %vm549_vm6, -1e+30, %v1011_v20 }
 0x234   : > { %vm538_vm7 = vcmp.eq.f32.partialorder %v1316_v14, %v1392_v55  ;;  %v603_v57 = vsel %vm473_vm2, %v1394_v56, -inf }
 0x235   : > { %v1400_v58 = vpop.xlane.xlu1 %478  ;;  %604 = vmax.xlane.f32.xlu1 %v603_v57  ;;  %v1403_v59 = vsel %vm538_vm7, -1e+30, %v1316_v14 }
 0x236   : > { %vm539_vm8 = vcmp.eq.f32.partialorder %v1319_v15, %v1400_v58  ;;  %v570_v17 = vsel %vm473_vm2, %v1403_v59, -inf }
 0x237   : > { %571 = vmax.xlane.f32.xlu0 %v570_v17  ;;  %v1409_v60 = vpop.xlane.xlu0 %499  ;;  %v1412_v61 = vsel %vm539_vm8, -1e+30, %v1319_v15 }
 0x238   : > { %vm546_vm9 = vcmp.eq.f32.partialorder %v1322_v19, %v1409_v60  ;;  %v573_v62 = vsel %vm473_vm2, %v1412_v61, -inf }
 0x239   : > { %v1418_v18 = vpop.xlane.xlu1 %502  ;;  %574 = vmax.xlane.f32.xlu1 %v573_v62  ;;  %v1421_v63 = vsel %vm546_vm9, -1e+30, %v1322_v19 }
 0x23a   : > { %vm547_vm10 = vcmp.eq.f32.partialorder %v1325_v21, %v1418_v18  ;;  %v594_v0 = vsel %vm473_vm2, %v1421_v63, -inf }
 0x23b   : > { %595 = vmax.xlane.f32.xlu0 %v594_v0  ;;  %v1427_v1 = vpop.xlane.xlu0 %493  ;;  %v1430_v2 = vsel %vm547_vm10, -1e+30, %v1325_v21 }
 0x23c   : > { %vm544_vm11 = vcmp.eq.f32.partialorder %v1332_v25, %v1427_v1  ;;  %v597_v28 = vsel %vm473_vm2, %v1430_v2, -inf }
 0x23d   : > { %v1436_v3 = vpop.xlane.xlu1 %496  ;;  %598 = vmax.xlane.f32.xlu1 %v597_v28  ;;  %v1439_v29 = vsel %vm544_vm11, -1e+30, %v1332_v25 }
 0x23e   : > { %vm545_vm12 = vcmp.eq.f32.partialorder %v1338_v30, %v1436_v3  ;;  %v588_v10 = vsel %vm473_vm2, %v1439_v29, -inf }
 0x23f   : > { %589 = vmax.xlane.f32.xlu0 %v588_v10  ;;  %v1445_v11 = vpop.xlane.xlu0 %487  ;;  %v1448_v12 = vsel %vm545_vm12, -1e+30, %v1338_v30 }
 0x240   : > { %vm542_vm13 = vcmp.eq.f32.partialorder %v1334_v26, %v1445_v11  ;;  %v591_v35 = vsel %vm473_vm2, %v1448_v12, -inf }
 0x241   : > { %v1454_v13 = vpop.xlane.xlu1 %490  ;;  %592 = vmax.xlane.f32.xlu1 %v591_v35  ;;  %v1457_v36 = vsel %vm542_vm13, -1e+30, %v1334_v26 }
 0x242   : > { %vm543_vm14 = vcmp.eq.f32.partialorder %v1340_v31, %v1454_v13  ;;  %v582_v14 = vsel %vm473_vm2, %v1457_v36, -inf }
 0x243   : > { %583 = vmax.xlane.f32.xlu0 %v582_v14  ;;  %v1463_v38 = vpop.xlane.xlu0 %511  ;;  %v1466_v39 = vsel %vm543_vm14, -1e+30, %v1340_v31 }
 0x244   : > { %vm550_vm15 = vcmp.eq.f32.partialorder %v1350_v40, %v1463_v38  ;;  %v585_v15 = vsel %vm473_vm2, %v1466_v39, -inf }
 0x245   : > { %586 = vmax.xlane.f32.xlu1 %v585_v15  ;;  %v1472_v16 = vpop.xlane.xlu1 %514  ;;  %v1475_v45 = vsel %vm550_vm15, -1e+30, %v1350_v40 }
 0x246   : > { %vm551_vm0 = vcmp.eq.f32.partialorder %v1356_v43, %v1472_v16  ;;  %v606_v19 = vsel %vm473_vm2, %v1475_v45, -inf }
 0x247   : > { %607 = vmax.xlane.f32.xlu0 %v606_v19  ;;  %v1481_v46 = vpop.xlane.xlu0 %517  ;;  %v1484_v20 = vsel %vm551_vm0, -1e+30, %v1356_v43 }
 0x248   : > { %vm552_vm1 = vcmp.eq.f32.partialorder %v1348_v37, %v1481_v46  ;;  %v609_v21 = vsel %vm473_vm2, %v1484_v20, -inf }
 0x249   : > { %610 = vmax.xlane.f32.xlu1 %v609_v21  ;;  %v1490_v22 = vpop.xlane.xlu1 %520  ;;  %v1493_v23 = vsel %vm552_vm1, -1e+30, %v1348_v37 }
 0x24a   : > { %vm553_vm3 = vcmp.eq.f32.partialorder %v1354_v42, %v1490_v22  ;;  %v612_v24 = vsel %vm473_vm2, %v1493_v23, -inf }
 0x24b   : > { %613 = vmax.xlane.f32.xlu0 %v612_v24  ;;  %v1500_v25 = vsel %vm553_vm3, -1e+30, %v1354_v42 }
 0x24c   : > { %v615_v26 = vsel %vm473_vm2, %v1500_v25, -inf }
 0x24d   : > { %616 = vmax.xlane.f32.xlu1 %v615_v26 }
 0x2b9   : > { %v1504_v27 = vpop.xlane.xlu0 %577 }
 0x2ba   : > { %vm636_vm4 = vcmp.eq.f32.partialorder %v1373_v49, %v1504_v27 }
 0x2bb   : > { %v1508_v30 = vpop.xlane.xlu1 %580  ;;  %v652_v31 = vsel %vm636_vm4, -1e+30, %v1373_v49 }
 0x2bc   : > { %vm637_vm5 = vcmp.eq.f32.partialorder %v1378_v51, %v1508_v30  ;;  %v672_v32 = vsel %vm473_vm2, %v652_v31, -inf }
 0x2bd   : > { %673 = vmax.xlane.f32.xlu0 %v672_v32  ;;  %v653_v33 = vsel %vm637_vm5, -1e+30, %v1378_v51  ;;  %vm757_vm5 = vcmask 130112  }
 0x2be   : > { %v675_v34 = vsel %vm473_vm2, %v653_v33, -inf  ;;  %v746_v33 = vlaneseq }
 0x2bf   : > { %676 = vmax.xlane.f32.xlu1 %v675_v34 }
 0x2c0   : > { %v1516_v37 = vpop.xlane.xlu0 %601  ;;  %v1600_v34 = vand.u32 127, %v746_v33 }
 0x2c1   : > { %vm644_vm6 = vcmp.eq.f32.partialorder %v1387_v9, %v1516_v37 }
 0x2c2   : > { %v1520_v40 = vpop.xlane.xlu1 %604  ;;  %v660_v41 = vsel %vm644_vm6, -1e+30, %v1387_v9  ;;  %vm822_vm6 = vcmask 1041409  }
 0x2c3   : > { %vm645_vm7 = vcmp.eq.f32.partialorder %v1394_v56, %v1520_v40  ;;  %v696_v42 = vsel %vm473_vm2, %v660_v41, -inf  ;;  %v749_v41 = vshrl.u32 %v746_v33, 7 }
 0x2c4   : > { %697 = vmax.xlane.f32.xlu0 %v696_v42  ;;  %v1526_v43 = vpop.xlane.xlu0 %571  ;;  %v661_v44 = vsel %vm645_vm7, -1e+30, %v1394_v56  ;;  %v752_v42 = vadd.s32 4294967288, %v1600_v34  ;;  %vm824_vm7 = vcmask 1042434  }
 0x2c5   : > { %vm634_vm8 = vcmp.eq.f32.partialorder %v1403_v59, %v1526_v43  ;;  %v699_v47 = vsel %vm473_vm2, %v661_v44, -inf }
 0x2c6   : > { %700 = vmax.xlane.f32.xlu1 %v699_v47  ;;  %v1532_v4 = vpop.xlane.xlu1 %574  ;;  %v650_v5 = vsel %vm634_vm8, -1e+30, %v1403_v59  ;;  %v621_v47 = vadd.f32 %v1508_v30, %v1371_v48  ;;  %v629_v48 = vadd.f32 %v1520_v40, %v1385_v53  ;;  %vm826_vm8 = vcmask 1043459  }
 0x2c7   : > { %vm635_vm9 = vcmp.eq.f32.partialorder %v1412_v61, %v1532_v4  ;;  %v666_v6 = vsel %vm473_vm2, %v650_v5, -inf  ;;  %v1608_v5 = vsub.s32 %v1600_v34, %v749_v41 }
 0x2c8   : > { %667 = vmax.xlane.f32.xlu0 %v666_v6  ;;  %v1538_v49 = vpop.xlane.xlu0 %595  ;;  %v651_v50 = vsel %vm635_vm9, -1e+30, %v1412_v61  ;;  %v1610_v6 = vsub.s32 %v752_v42, %v749_v41  ;;  %vm828_vm9 = vcmask 1044484  }
 0x2c9   : > { %vm642_vm10 = vcmp.eq.f32.partialorder %v1421_v63, %v1538_v49  ;;  %v669_v51 = vsel %vm473_vm2, %v651_v50, -inf }
 0x2ca   : > { %670 = vmax.xlane.f32.xlu1 %v669_v51  ;;  %v1544_v52 = vpop.xlane.xlu1 %598  ;;  %v658_v9 = vsel %vm642_vm10, -1e+30, %v1421_v63  ;;  %vm830_vm10 = vcmask 1045509  }
 0x2cb   : > { %vm643_vm11 = vcmp.eq.f32.partialorder %v1430_v2, %v1544_v52  ;;  %v690_v54 = vsel %vm473_vm2, %v658_v9, -inf }
 0x2cc   : > { %691 = vmax.xlane.f32.xlu0 %v690_v54  ;;  %v1550_v56 = vpop.xlane.xlu0 %589  ;;  %v659_v57 = vsel %vm643_vm11, -1e+30, %v1430_v2  ;;  %vm832_vm11 = vcmask 1046534  }
 0x2cd   : > { %vm640_vm12 = vcmp.eq.f32.partialorder %v1439_v29, %v1550_v56  ;;  %v693_v59 = vsel %vm473_vm2, %v659_v57, -inf }
 0x2ce   : > { %694 = vmax.xlane.f32.xlu1 %v693_v59  ;;  %v1556_v17 = vpop.xlane.xlu1 %592  ;;  %v656_v61 = vsel %vm640_vm12, -1e+30, %v1439_v29  ;;  %vm834_vm12 = vcmask 1047559  }
 0x2cf   : > { %vm641_vm13 = vcmp.eq.f32.partialorder %v1448_v12, %v1556_v17  ;;  %v684_v62 = vsel %vm473_vm2, %v656_v61, -inf  ;;  %v618_v61 = vadd.f32 %v1526_v43, %v1392_v55  ;;  %v627_v55 = vadd.f32 %v1544_v52, %v1418_v18 }
 0x2d0   : > { %685 = vmax.xlane.f32.xlu0 %v684_v62  ;;  %v1562_v63 = vpop.xlane.xlu0 %583  ;;  %v657_v0 = vsel %vm641_vm13, -1e+30, %v1448_v12 }
 0x2d1   : > { %vm638_vm14 = vcmp.eq.f32.partialorder %v1457_v36, %v1562_v63  ;;  %v687_v2 = vsel %vm473_vm2, %v657_v0, -inf }
 0x2d2   : > { %688 = vmax.xlane.f32.xlu1 %v687_v2  ;;  %v1568_v28 = vpop.xlane.xlu1 %586  ;;  %v654_v29 = vsel %vm638_vm14, -1e+30, %v1457_v36  ;;  %v619_v2 = vadd.f32 %v1532_v4, %v1400_v58  ;;  %vm845_vm14 = vcmask 39936  }
 0x2d3   : > { %vm639_vm15 = vcmp.eq.f32.partialorder %v1466_v39, %v1568_v28  ;;  %v678_v10 = vsel %vm473_vm2, %v654_v29, -inf  ;;  %v623_v41 = vadd.f32 %v1568_v28, %v1454_v13 }
 0x2d4   : > { %679 = vmax.xlane.f32.xlu0 %v678_v10  ;;  %v1574_v35 = vpop.xlane.xlu0 %607  ;;  %v655_v12 = vsel %vm639_vm15, -1e+30, %v1466_v39 }
 0x2d5   : > { %vm646_vm0 = vcmp.eq.f32.partialorder %v1475_v45, %v1574_v35  ;;  %v681_v14 = vsel %vm473_vm2, %v655_v12, -inf  ;;  %v626_v12 = vadd.f32 %v1538_v49, %v1409_v60 }
 0x2d6   : > { %682 = vmax.xlane.f32.xlu1 %v681_v14  ;;  %v1580_v15 = vpop.xlane.xlu1 %610  ;;  %v662_v36 = vsel %vm646_vm0, -1e+30, %v1475_v45 }
 0x2d7   : > { %vm647_vm1 = vcmp.eq.f32.partialorder %v1484_v20, %v1580_v15  ;;  %v702_v19 = vsel %vm473_vm2, %v662_v36, -inf }
 0x2d8   : > { %703 = vmax.xlane.f32.xlu0 %v702_v19  ;;  %v1586_v21 = vpop.xlane.xlu0 %613  ;;  %v663_v39 = vsel %vm647_vm1, -1e+30, %v1484_v20  ;;  %v624_v19 = vadd.f32 %v1550_v56, %v1427_v1 }
 0x2d9   : > { %vm648_vm3 = vcmp.eq.f32.partialorder %v1493_v23, %v1586_v21  ;;  %v705_v24 = vsel %vm473_vm2, %v663_v39, -inf }
 0x2da   : > { %706 = vmax.xlane.f32.xlu1 %v705_v24  ;;  %v1592_v26 = vpop.xlane.xlu1 %616  ;;  %v664_v45 = vsel %vm648_vm3, -1e+30, %v1493_v23  ;;  %v620_v23 = vadd.f32 %v1504_v27, %v1368_v7  ;;  %v628_v7 = vadd.f32 %v1516_v37, %v1382_v8 }
 0x2db   : > { %vm649_vm4 = vcmp.eq.f32.partialorder %v1500_v25, %v1592_v26  ;;  %v708_v31 = vsel %vm473_vm2, %v664_v45, -inf  ;;  %v625_v45 = vadd.f32 %v1556_v17, %v1436_v3 }
 0x2dc   : > { %709 = vmax.xlane.f32.xlu0 %v708_v31  ;;  %v665_v32 = vsel %vm649_vm4, -1e+30, %v1500_v25 }
 0x2dd   : > { %v711_v20 = vsel %vm473_vm2, %v665_v32, -inf }
 0x2de   : > { %712 = vmax.xlane.f32.xlu1 %v711_v20  ;;  %v622_v20 = vadd.f32 %v1562_v63, %v1445_v11  ;;  %v631_v11 = vadd.f32 %v1580_v15, %v1472_v16 }
 0x34a   : > { %v674_v44 = vpop.xlane.xlu0 %673 }
 0x34b   : > { %v716_v25 = vadd.f32 %v674_v44, %v620_v23  ;;  %v630_v44 = vadd.f32 %v1574_v35, %v1463_v38 }
 0x34c   : > { %v677_v50 = vpop.xlane.xlu1 %676 }
 0x34d   : > { %v717_v51 = vadd.f32 %v677_v50, %v621_v47  ;;  %v762_v9 = vrot.slane %v716_v25, %v1608_v5 }
 0x34f   : > { %v766_v54 = vrot.slane %v717_v51, %v1610_v6 }
 0x351   : > { %v767_v27 = vsel %vm757_vm5, %v766_v54, %v762_v9  ;;  %v698_v57 = vpop.xlane.xlu0 %697  ;;  %v632_v9 = vadd.f32 %v1586_v21, %v1481_v46  ;;  %v633_v54 = vadd.f32 %v1592_v26, %v1490_v22 }
 0x352   : > { %v724_v30 = vadd.f32 %v698_v57, %v628_v7 }
 0x353   : > { %v701_v59 = vpop.xlane.xlu1 %700 }
 0x354   : > { %v725_v62 = vadd.f32 %v701_v59, %v629_v48  ;;  %v798_v29 = vrot.slane %v724_v30, %v1608_v5 }
 0x355   : > { %v668_v0 = vpop.xlane.xlu0 %667 }
 0x356   : > { %v802_v8 = vrot.slane %v725_v62, %v1610_v6  ;;  %v714_v37 = vadd.f32 %v668_v0, %v618_v61 }
 0x357   : > { %v671_v10 = vpop.xlane.xlu1 %670 }
 0x358   : > { %v803_v53 = vsel %vm757_vm5, %v802_v8, %v798_v29  ;;  %v715_v40 = vadd.f32 %v671_v10, %v619_v2  ;;  %v751_v14 = vrot.slane %v714_v37, %v1608_v5  ;;  %v841_v8 = vstv %s1117_s9  ;;  %v840_v37 = vld [vmem:[%s1198_s29] sm:$0xff] }
 0x359   : > { %v692_v43 = vpop.xlane.xlu0 %691  ;;  %vm842_vm13 = vcmp.eq.s32.totalorder %v1600_v34, %v841_v8 }
 0x35a   : > { %v756_v58 = vrot.slane %v715_v40, %v1610_v6  ;;  %v722_v4 = vadd.f32 %v692_v43, %v626_v12 }
 0x35b   : > { %v695_v36 = vpop.xlane.xlu1 %694 }
 0x35c   : > { %v758_v39 = vsel %vm757_vm5, %v756_v58, %v751_v14  ;;  %v723_v60 = vadd.f32 %v695_v36, %v627_v55  ;;  %v789_v18 = vrot.slane %v722_v4, %v1608_v5 }
 0x35d   : > { %v823_v49 = vsel %vm822_vm6, %v767_v27, %v758_v39  ;;  %v686_v24 = vpop.xlane.xlu0 %685 }
 0x35e   : > { %v793_v52 = vrot.slane %v723_v60, %v1610_v6  ;;  %v720_v31 = vadd.f32 %v686_v24, %v624_v19 }
 0x35f   : > { %v689_v32 = vpop.xlane.xlu1 %688 }
 0x360   : > { %v794_v33 = vsel %vm757_vm5, %v793_v52, %v789_v18  ;;  %v721_v1 = vadd.f32 %v689_v32, %v625_v45  ;;  %v780_v42 = vrot.slane %v720_v31, %v1608_v5 }
 0x361   : > { %v680_v56 = vpop.xlane.xlu0 %679 }
 0x362   : > { %v784_v3 = vrot.slane %v721_v1, %v1610_v6  ;;  %v718_v17 = vadd.f32 %v680_v56, %v622_v20 }
 0x363   : > { %v683_v23 = vpop.xlane.xlu1 %682 }
 0x364   : > { %v785_v47 = vsel %vm757_vm5, %v784_v3, %v780_v42  ;;  %v719_v25 = vadd.f32 %v683_v23, %v623_v41  ;;  %v771_v50 = vrot.slane %v718_v17, %v1608_v5 }
 0x365   : > { %v704_v63 = vpop.xlane.xlu0 %703 }
 0x366   : > { %v775_v13 = vrot.slane %v719_v25, %v1610_v6  ;;  %v726_v28 = vadd.f32 %v704_v63, %v630_v44 }
 0x367   : > { %v707_v51 = vpop.xlane.xlu1 %706 }
 0x368   : > { %v776_v38 = vsel %vm757_vm5, %v775_v13, %v771_v50  ;;  %v727_v35 = vadd.f32 %v707_v51, %v631_v11  ;;  %v807_v7 = vrot.slane %v726_v28, %v1608_v5 }
 0x369   : > { %v825_v16 = vsel %vm824_vm7, %v776_v38, %v823_v49  ;;  %v710_v15 = vpop.xlane.xlu0 %709 }
 0x36a   : > { %v811_v27 = vrot.slane %v727_v35, %v1610_v6  ;;  %v728_v57 = vadd.f32 %v710_v15, %v632_v9  ;;  %v827_v48 = vsel %vm826_vm8, %v785_v47, %v825_v16 }
 0x36b   : > { %v713_v46 = vpop.xlane.xlu1 %712  ;;  %v829_v21 = vsel %vm828_vm9, %v794_v33, %v827_v48 }
 0x36c   : > { %v729_v30 = vadd.f32 %v713_v46, %v633_v54  ;;  %v812_v59 = vsel %vm757_vm5, %v811_v27, %v807_v7  ;;  %v831_v61 = vsel %vm830_vm10, %v803_v53, %v829_v21  ;;  %v816_v26 = vrot.slane %v728_v57, %v1608_v5 }
 0x36d   : > { %v833_v22 = vsel %vm832_vm11, %v812_v59, %v831_v61 }
 0x36e   : > { %v820_v62 = vrot.slane %v729_v30, %v1610_v6 }
 0x370   : > { %v821_v0 = vsel %vm757_vm5, %v820_v62, %v816_v26 }
 0x371   : > { %v835_v2 = vsel %vm834_vm12, %v821_v0, %v833_v22 }
 0x372   : > { %v837_v29 = vsel %vm473_vm2, %v835_v2, 0.0 }
 0x373   : > { %838 = vadd.xlane.f32.xlu0 %v837_v29 }
 0x400   : > { %v839_v10 = vpop.xlane.xlu0 %838 }
 0x401   : > { %v843_v12 = vsel %vm842_vm13, %v839_v10, 0.0 }
 0x402   : > { %v844_v53 = vadd.f32 %v843_v12, %v840_v37 }
 0x404   : > { %846 = vst.msk [vmem:[%s1198_s29] sm:$0xff] %vm845_vm14, %v844_v53 }
 0x405 PF: > { %s12_s13 = sadd.s32 1, %s1133_s13   ;;  %s1687_s9 = smov %s1125_s11 }
 0x406   : > { %p9_p9 = scmp.ge.s32.totalorder %s12_s13, 12   ;;  %s1688_s10 = smov %s1129_s12 }
 0x407   : > { %s1689_s11 = smov %s1692_s14  ;;  %s1690_s12 = smov %s1696_s15 }
 0x408   :  { %11 = sbr.rel (!%p9_p9) target bundleno = 3 (0x3), region = 65 }

</bundles_post_ra>
